<compile_context>
chip_gen: v6e
topology: v6e:2x2x1
jax: 0.10.0
libtpu: 0.0.40
codegen_flags: <defaults>
</compile_context>

<pallas_src>
import jax
import jax.numpy as jnp
from jax.experimental import pallas as pl
from jax.experimental.pallas import tpu as pltpu


def _nca_forward_kernel(x_ref, w1_ref, b1_ref, w3_ref, b3_ref, w2_ref, b2_ref,
                        o_ref):
    # x_ref: (C_in, T) bf16 tile of pixels for one batch element.
    x = x_ref[...]
    h = jnp.dot(w1_ref[...], x, preferred_element_type=jnp.float32) + b1_ref[...]
    h = jnp.maximum(h, 0.0).astype(jnp.bfloat16)          # ReLU, bf16 for next MXU
    h = jnp.dot(w3_ref[...], h, preferred_element_type=jnp.float32) + b3_ref[...]
    h = jnp.maximum(h, 0.0).astype(jnp.bfloat16)          # ReLU
    o = jnp.dot(w2_ref[...], h, preferred_element_type=jnp.float32) + b2_ref[...]
    o_ref[...] = o.astype(o_ref.dtype)                    # (C_out, T) lane-dense f32


def _choose_tiling(B, HW, cap=16384):
    """Pick a lane-aligned spatial tile.

    Returns (tile_hw, hw_pad, n_hw) with tile_hw a multiple of 128,
    hw_pad = n_hw * tile_hw >= HW.  Guarantees >= 2 total grid steps when
    possible so v7x's two TensorCores are both used.
    """
    assert cap % 128 == 0 and cap >= 128
    hw_lane = max(128, ((HW + 127) // 128) * 128)
    tile = min(hw_lane, cap)
    hw_pad = ((HW + tile - 1) // tile) * tile
    n_hw = hw_pad // tile
    if B * n_hw < 2 and tile >= 256:
        tile = max(128, ((tile // 2) // 128) * 128)        # split spatial for 2 TCs
        hw_pad = ((HW + tile - 1) // tile) * tile
        n_hw = hw_pad // tile
    return tile, hw_pad, n_hw


@jax.jit
def nca_forward(x_nchw, w1, b1, w3, b3, w2, b2):
    """x_nchw: (B, C_in, H, W) float32.
    w*: (C_out, C_in) 1x1-conv weights (squeezed), b*: (C_out,) biases."""
    B, C_in, H, W = x_nchw.shape
    hidden = w1.shape[0]
    C_out = w2.shape[0]
    HW = H * W

    # Free reshape, no transpose: (B, C_in, H, W) -> (B, C_in, H*W)
    x_flat = x_nchw.reshape(B, C_in, HW)

    tile_hw, hw_pad, n_hw = _choose_tiling(B, HW)
    if hw_pad != HW:
        x_flat = jnp.pad(x_flat, ((0, 0), (0, 0), (0, hw_pad - HW)))

    # bf16 MXU inputs (halves HBM bytes for the dominant x stream); f32 biases.
    xb = x_flat.astype(jnp.bfloat16)
    w1b = w1.astype(jnp.bfloat16)                         # (hidden, C_in)
    w3b = w3.astype(jnp.bfloat16)                         # (hidden, hidden)
    w2b = w2.astype(jnp.bfloat16)                         # (C_out, hidden)
    b1c = b1.reshape(hidden, 1).astype(jnp.float32)
    b3c = b3.reshape(hidden, 1).astype(jnp.float32)
    b2c = b2.reshape(C_out, 1).astype(jnp.float32)

    flops = 2 * B * hw_pad * (C_in * hidden + hidden * hidden + hidden * C_out)
    bytes_accessed = (2 * B * C_in * hw_pad            # bf16 x read
                      + 4 * B * C_out * hw_pad         # f32 out write
                      + 2 * (w1b.size + w3b.size + w2b.size)
                      + 4 * (b1c.size + b3c.size + b2c.size))
    cost = pl.CostEstimate(flops=int(flops), transcendentals=0,
                           bytes_accessed=int(bytes_accessed))

    out_flat = pl.pallas_call(
        _nca_forward_kernel,
        out_shape=jax.ShapeDtypeStruct((B, C_out, hw_pad), jnp.float32),
        grid_spec=pltpu.PrefetchScalarGridSpec(
            num_scalar_prefetch=0,
            grid=(B, n_hw),
            in_specs=[
                # x tile: (C_in, tile_hw), batch dim squeezed.
                pl.BlockSpec((None, C_in, tile_hw), lambda b, j: (b, 0, j)),
                pl.BlockSpec((hidden, C_in), lambda b, j: (0, 0)),    # w1
                pl.BlockSpec((hidden, 1), lambda b, j: (0, 0)),       # b1
                pl.BlockSpec((hidden, hidden), lambda b, j: (0, 0)),  # w3
                pl.BlockSpec((hidden, 1), lambda b, j: (0, 0)),       # b3
                pl.BlockSpec((C_out, hidden), lambda b, j: (0, 0)),   # w2
                pl.BlockSpec((C_out, 1), lambda b, j: (0, 0)),        # b2
            ],
            out_specs=pl.BlockSpec((None, C_out, tile_hw),
                                   lambda b, j: (b, 0, j)),
        ),
        compiler_params=pltpu.CompilerParams(
            dimension_semantics=("parallel", "parallel"),
            vmem_limit_bytes=32 * 1024 * 1024),
        cost_estimate=cost,
    )(xb, w1b, b1c, w3b, b3c, w2b, b2c)

    # Drop spatial padding (no-op slice if hw_pad == HW), free reshape back.
    return out_flat[:, :, :HW].reshape(B, C_out, H, W)


def _init_conv1x1_params(key, c_out, c_in):
    """Deterministic init mimicking torch.nn.Conv2d default (uniform +-1/sqrt(fan_in))
    for a 1x1 kernel; returns (weight (c_out, c_in), bias (c_out,))."""
    kw, kb = jax.random.split(key)
    bound = 1.0 / jnp.sqrt(float(c_in))
    w = jax.random.uniform(kw, (c_out, c_in), jnp.float32, -bound, bound)
    b = jax.random.uniform(kb, (c_out,), jnp.float32, -bound, bound)
    return w, b


if __name__ == "__main__":
    # Shapes consistent with the NCA module: forward consumes `in_features`
    # channels (= out_features * 4 after the sense-concat in the full NCA loop).
    out_features = 4
    in_features = out_features * 4   # 16
    hidden_dim = 32
    B, Hs, Ws = 2, 16, 16

    key = jax.random.PRNGKey(0)
    kx, k1, k3, k2 = jax.random.split(key, 4)

    x = jax.random.normal(kx, (B, in_features, Hs, Ws), jnp.float32)

    w1, b1 = _init_conv1x1_params(k1, hidden_dim, in_features)   # conv1
    w3, b3 = _init_conv1x1_params(k3, hidden_dim, hidden_dim)    # conv3
    w2, b2 = _init_conv1x1_params(k2, out_features, hidden_dim)  # conv2

    # TODO(synk): the NCA __call__/sense/update loop (3x3 conv_sense, max_pool
    # life masks, stochastic async update) lives outside forward() and is not
    # part of this kernel; only the forward hot path is fused here.

    out = nca_forward(x, w1, b1, w3, b3, w2, b2)
    out = jax.block_until_ready(out)

    # Pure-JAX reference mimicking the kernel's bf16-input / f32-accumulate path.
    def bf(a):
        return a.astype(jnp.bfloat16).astype(jnp.float32)

    xf = jnp.transpose(bf(x), (0, 2, 3, 1)).reshape(-1, in_features)
    ref = jnp.maximum(xf @ bf(w1).T + b1, 0.0)
    ref = bf(ref)
    ref = jnp.maximum(ref @ bf(w3).T + b3, 0.0)
    ref = bf(ref)
    ref = ref @ bf(w2).T + b2
    ref = ref.reshape(B, Hs, Ws, out_features).transpose(0, 3, 1, 2)

    assert out.shape == (B, out_features, Hs, Ws)
    assert jnp.allclose(out, ref, atol=2e-2, rtol=2e-2), (
        float(jnp.max(jnp.abs(out - ref))))

    print("KERNEL_OK")
</pallas_src>

<mosaic_0001>
module attributes {stable_mosaic.version = 11 : i64} {
  func.func @_nca_forward_kernel(%arg0: i32, %arg1: i32, %arg2: memref<1x16x256xbf16, #tpu.memory_space<vmem>>, %arg3: memref<32x16xbf16, #tpu.memory_space<vmem>>, %arg4: memref<32x1xf32, #tpu.memory_space<vmem>>, %arg5: memref<32x32xbf16, #tpu.memory_space<vmem>>, %arg6: memref<32x1xf32, #tpu.memory_space<vmem>>, %arg7: memref<4x32xbf16, #tpu.memory_space<vmem>>, %arg8: memref<4x1xf32, #tpu.memory_space<vmem>>, %arg9: memref<1x4x256xf32, #tpu.memory_space<vmem>>) attributes {dimension_semantics = [#tpu.dimension_semantics<parallel>, #tpu.dimension_semantics<parallel>], iteration_bounds = array<i64: 2, 1>, scalar_prefetch = 0 : i64, scratch_operands = 0 : i64, tpu.core_type = #tpu.core_type<tc>, window_params = [{transform_indices = @transform_0, window_bounds = array<i64: 1, 16, 256>}, {pipeline_mode = #tpu.pipeline_mode<synchronous>, transform_indices = @transform_1, window_bounds = array<i64: 32, 16>}, {pipeline_mode = #tpu.pipeline_mode<synchronous>, transform_indices = @transform_2, window_bounds = array<i64: 32, 1>}, {pipeline_mode = #tpu.pipeline_mode<synchronous>, transform_indices = @transform_3, window_bounds = array<i64: 32, 32>}, {pipeline_mode = #tpu.pipeline_mode<synchronous>, transform_indices = @transform_4, window_bounds = array<i64: 32, 1>}, {pipeline_mode = #tpu.pipeline_mode<synchronous>, transform_indices = @transform_5, window_bounds = array<i64: 4, 32>}, {pipeline_mode = #tpu.pipeline_mode<synchronous>, transform_indices = @transform_6, window_bounds = array<i64: 4, 1>}, {transform_indices = @transform_7, window_bounds = array<i64: 1, 4, 256>}]} {
    %c0 = arith.constant 0 : index
    %c0_0 = arith.constant 0 : index
    %c0_1 = arith.constant 0 : index
    %0 = vector.load %arg2[%c0, %c0_0, %c0_1] : memref<1x16x256xbf16, #tpu.memory_space<vmem>>, vector<1x16x256xbf16>
    %1 = vector.shape_cast %0 : vector<1x16x256xbf16> to vector<16x256xbf16>
    %c0_2 = arith.constant 0 : index
    %c0_3 = arith.constant 0 : index
    %2 = vector.load %arg3[%c0_2, %c0_3] : memref<32x16xbf16, #tpu.memory_space<vmem>>, vector<32x16xbf16>
    %cst = arith.constant dense<0.000000e+00> : vector<32x256xf32>
    %3 = tpu.matmul %2, %1, %cst {dimension_numbers = #tpu.dot_dimension_numbers<[1], [0], [0], [1], [0, 0, 1, 1], [], []>} : vector<32x16xbf16>, vector<16x256xbf16>, vector<32x256xf32> -> vector<32x256xf32>
    %c0_4 = arith.constant 0 : index
    %c0_5 = arith.constant 0 : index
    %4 = vector.load %arg4[%c0_4, %c0_5] : memref<32x1xf32, #tpu.memory_space<vmem>>, vector<32x1xf32>
    %5 = vector.broadcast %4 : vector<32x1xf32> to vector<32x256xf32>
    %6 = arith.addf %3, %5 : vector<32x256xf32>
    %cst_6 = arith.constant 0.000000e+00 : f32
    %7 = vector.broadcast %cst_6 : f32 to vector<32x256xf32>
    %8 = arith.maximumf %6, %7 : vector<32x256xf32>
    %9 = arith.truncf %8 : vector<32x256xf32> to vector<32x256xbf16>
    %c0_7 = arith.constant 0 : index
    %c0_8 = arith.constant 0 : index
    %10 = vector.load %arg5[%c0_7, %c0_8] : memref<32x32xbf16, #tpu.memory_space<vmem>>, vector<32x32xbf16>
    %cst_9 = arith.constant dense<0.000000e+00> : vector<32x256xf32>
    %11 = tpu.matmul %10, %9, %cst_9 {dimension_numbers = #tpu.dot_dimension_numbers<[1], [0], [0], [1], [0, 0, 1, 1], [], []>} : vector<32x32xbf16>, vector<32x256xbf16>, vector<32x256xf32> -> vector<32x256xf32>
    %c0_10 = arith.constant 0 : index
    %c0_11 = arith.constant 0 : index
    %12 = vector.load %arg6[%c0_10, %c0_11] : memref<32x1xf32, #tpu.memory_space<vmem>>, vector<32x1xf32>
    %13 = vector.broadcast %12 : vector<32x1xf32> to vector<32x256xf32>
    %14 = arith.addf %11, %13 : vector<32x256xf32>
    %cst_12 = arith.constant 0.000000e+00 : f32
    %15 = vector.broadcast %cst_12 : f32 to vector<32x256xf32>
    %16 = arith.maximumf %14, %15 : vector<32x256xf32>
    %17 = arith.truncf %16 : vector<32x256xf32> to vector<32x256xbf16>
    %c0_13 = arith.constant 0 : index
    %c0_14 = arith.constant 0 : index
    %18 = vector.load %arg7[%c0_13, %c0_14] : memref<4x32xbf16, #tpu.memory_space<vmem>>, vector<4x32xbf16>
    %cst_15 = arith.constant dense<0.000000e+00> : vector<4x256xf32>
    %19 = tpu.matmul %18, %17, %cst_15 {dimension_numbers = #tpu.dot_dimension_numbers<[1], [0], [0], [1], [0, 0, 1, 1], [], []>} : vector<4x32xbf16>, vector<32x256xbf16>, vector<4x256xf32> -> vector<4x256xf32>
    %c0_16 = arith.constant 0 : index
    %c0_17 = arith.constant 0 : index
    %20 = vector.load %arg8[%c0_16, %c0_17] : memref<4x1xf32, #tpu.memory_space<vmem>>, vector<4x1xf32>
    %21 = vector.broadcast %20 : vector<4x1xf32> to vector<4x256xf32>
    %22 = arith.addf %19, %21 : vector<4x256xf32>
    %c0_18 = arith.constant 0 : index
    %c0_19 = arith.constant 0 : index
    %c0_20 = arith.constant 0 : index
    %23 = vector.load %arg9[%c0_18, %c0_19, %c0_20] : memref<1x4x256xf32, #tpu.memory_space<vmem>>, vector<1x4x256xf32>
    %24 = vector.shape_cast %23 : vector<1x4x256xf32> to vector<4x256xf32>
    %25 = vector.shape_cast %22 : vector<4x256xf32> to vector<1x4x256xf32>
    tpu.vector_store %arg9[%c0_18, %c0_19, %c0_20], %25 {strides = array<i32>} : memref<1x4x256xf32, #tpu.memory_space<vmem>>, vector<1x4x256xf32>,
    return
  }
  func.func @transform_0(%arg0: i32, %arg1: i32) -> (i32, i32, i32) {
    %c0_i32 = arith.constant 0 : i32
    %c0_i32_0 = arith.constant 0 : i32
    return %arg0, %c0_i32, %arg1 : i32, i32, i32
  }
  func.func @transform_1(%arg0: i32, %arg1: i32) -> (i32, i32) {
    %c0_i32 = arith.constant 0 : i32
    %c0_i32_0 = arith.constant 0 : i32
    %c0_i32_1 = arith.constant 0 : i32
    return %c0_i32, %c0_i32_0 : i32, i32
  }
  func.func @transform_2(%arg0: i32, %arg1: i32) -> (i32, i32) {
    %c0_i32 = arith.constant 0 : i32
    %c0_i32_0 = arith.constant 0 : i32
    %c0_i32_1 = arith.constant 0 : i32
    return %c0_i32, %c0_i32_0 : i32, i32
  }
  func.func @transform_3(%arg0: i32, %arg1: i32) -> (i32, i32) {
    %c0_i32 = arith.constant 0 : i32
    %c0_i32_0 = arith.constant 0 : i32
    %c0_i32_1 = arith.constant 0 : i32
    return %c0_i32, %c0_i32_0 : i32, i32
  }
  func.func @transform_4(%arg0: i32, %arg1: i32) -> (i32, i32) {
    %c0_i32 = arith.constant 0 : i32
    %c0_i32_0 = arith.constant 0 : i32
    %c0_i32_1 = arith.constant 0 : i32
    return %c0_i32, %c0_i32_0 : i32, i32
  }
  func.func @transform_5(%arg0: i32, %arg1: i32) -> (i32, i32) {
    %c0_i32 = arith.constant 0 : i32
    %c0_i32_0 = arith.constant 0 : i32
    %c0_i32_1 = arith.constant 0 : i32
    return %c0_i32, %c0_i32_0 : i32, i32
  }
  func.func @transform_6(%arg0: i32, %arg1: i32) -> (i32, i32) {
    %c0_i32 = arith.constant 0 : i32
    %c0_i32_0 = arith.constant 0 : i32
    %c0_i32_1 = arith.constant 0 : i32
    return %c0_i32, %c0_i32_0 : i32, i32
  }
  func.func @transform_7(%arg0: i32, %arg1: i32) -> (i32, i32, i32) {
    %c0_i32 = arith.constant 0 : i32
    %c0_i32_0 = arith.constant 0 : i32
    return %arg0, %c0_i32, %arg1 : i32, i32, i32
  }
}

</mosaic_0001>

<bundles_post_ra>
// kernel: nca_forward.1
= control target key start
LH: loop header
LB: loop body
LE: loop exit
PB: predicated region body
PF: predicated region fallthrough
CT: control target
= control target key end

     0   :  { %s817_s24 = smov 0   ;;  %s819_s25 = smov 0   ;;  %s906_s0 = inlined_call_operand.vmem [shape: bf16[2,16,256], index: 0, kind: input, shape index: {}]   ;;  %s907_s1 = inlined_call_operand.vmem [shape: bf16[32,16], index: 1, kind: input, shape index: {}]   ;;  %s908_s2 = inlined_call_operand.vmem [shape: f32[32,1], index: 2, kind: input, shape index: {}]   ;;  %s909_s3 = inlined_call_operand.vmem [shape: bf16[32,32], index: 3, kind: input, shape index: {}]   ;;  %s910_s4 = inlined_call_operand.vmem [shape: f32[32,1], index: 4, kind: input, shape index: {}]   ;;  %s911_s5 = inlined_call_operand.vmem [shape: bf16[4,32], index: 5, kind: input, shape index: {}]   ;;  %s912_s6 = inlined_call_operand.vmem [shape: f32[4,1], index: 6, kind: input, shape index: {}]   ;;  %s913_s7 = inlined_call_operand.vmem [shape: f32[2,4,256], index: 7, kind: output, shape index: {}]  }
   0x1   :  { %s821_s26 = smov 0  }
   0x2 LB: > { %s29_s27 = sadd.s32 1, %s770_s25  ;;  %p698_p0 = scmp.ge.s32.totalorder %s774_s26, 1  ;;  %s774_s26 = sphi %s821_s26, %s17_s26   ;;  %s770_s25 = sphi %s819_s25, %s915_s25   ;;  %s766_s24 = sphi %s817_s24, %s914_s24  }
   0x3   : > { %p31_p1 = scmp.ge.s32.totalorder %s29_s27, 2  ;;  %p258_p2 = scmp.lt.s32.totalorder %s774_s26, 3 }
   0x5   : > { %s917_s27 = smov (%p31_p1, %s29_s27), 0  ;;  %p259_p3 = pnand %p698_p0, %p258_p2 }
   0x6   : > { %p299_p4 = scmp.lt.s32.totalorder (!%p259_p3), %s766_s24, 1 }
   0x7   : > { %262 = sbr.rel (%p259_p3) target bundleno = 662 (0x296), region = 48 }
   0xc   : > { %v776_v0 = vmov 0   ;;  %s919_s24 = smov (!%p299_p4, %s766_s24), 1  ;;  %v327_v1 = vld [vmem:[%s908_s2 + $0x10] sm:$0xff]  ;;  %v325_v2 = vld [vmem:[%s908_s2] sm:$0xff]  ;;  %v328_v3 = vld [vmem:[%s908_s2 + $0x18] sm:$0xff]  ;;  %vm369_vm0 = vcmask 130048  }
   0xd   : > { %408 = vmatprep.mubr.bf16.mxu0 %v776_v0  ;;  %743 = vset.pattern.permute.xlu0 %v776_v0  ;;  %s716_s9 = sshll.u32 %s919_s24, 4  ;;  %v326_v4 = vld [vmem:[%s908_s2 + $0x8] sm:$0xff]  ;;  %v748_v7 = vld [vmem:[%s907_s1] sm:$0xff]   ;;  %v447_v8 = vld [vmem:[%s910_s4 + $0x10] sm:$0xff]  ;;  %vm479_vm1 = vcmask 261120   ;;  %s717_s18 = sshll.u32 %s919_s24, 3 }
   0xe   : > { %744 = vset.pattern.permute.xlu1 %v776_v0  ;;  %518 = vmatprep.mubr.bf16.mxu1 %v776_v0  ;;  %s306_s14 = scalar_lea.vmem %s906_s0, %s716_s9  ;;  %v448_v9 = vld [vmem:[%s910_s4 + $0x18] sm:$0xff]  ;;  %v445_v10 = vld [vmem:[%s910_s4] sm:$0xff]  ;;  %v446_v11 = vld [vmem:[%s910_s4 + $0x8] sm:$0xff]  ;;  %s316_s21 = scalar_lea.vmem %s913_s7, %s717_s18 }
   0xf   : > { %341 = vperm.xlu0 %743, %v327_v1   ;;  %331 = vperm.xlu1 %744, %v325_v2   ;;  %v745_v5 = vld [vmem:[%s306_s14 + $0x4] ss:$8 sps:$4 sm:$0xff]   ;;  %v747_v6 = vld [vmem:[%s306_s14] ss:$8 sps:$4 sm:$0xff]  }
  0x10   : > { %390 = vmatprep.subr.bf16.mxu0 %v745_v5  ;;  %v749_v12 = vld [vmem:[%s907_s1 + $0x8] sm:$0xff]   ;;  %v552_v13 = vld [vmem:[%s912_s6] sm:$0xf] }
  0x11   : > { %391 = vmatpush1.bf16.msra.mxu0 %v747_v6  ;;  %v750_v46 = vld [vmem:[%s909_s3] sm:$0xff]   ;;  %v751_v47 = vld [vmem:[%s909_s3 + $0x8] sm:$0xff]  }
  0x13   : > { %346 = vperm.xlu0 %743, %v328_v3   ;;  %336 = vperm.xlu1 %744, %v326_v4  }
  0x14   : > { %707 = vmatmul.mubr.msk.bf16.vlgmr.msra.gmra.mxu0 %vm369_vm0, %v748_v7 }
  0x15   : > { %418 = vmatprep.mubr.bf16.mxu0 %v776_v0 }
  0x17   : > { %461 = vperm.xlu0 %743, %v447_v8   ;;  %466 = vperm.xlu1 %744, %v448_v9  }
  0x1b   : > { %451 = vperm.xlu0 %743, %v445_v10   ;;  %456 = vperm.xlu1 %744, %v446_v11  }
  0x1c   : > { %708 = vmatmul.mubr.msk.bf16.gmra.mxu0 %vm369_vm0, %v749_v12 }
  0x1d   : > { %593 = vmatprep.mubr.bf16.mxu0 %v776_v0 }
  0x1f   : > { %555 = vperm.xlu0 %743, %v552_v13  }
  0x8a   : > { %v342_v17 = vpop.permute.xlu0 %341  ;;  %v332_v18 = vpop.permute.xlu1 %331 }
  0x8e   : > { %v347_v22 = vpop.permute.xlu0 %346  ;;  %v337_v23 = vpop.permute.xlu1 %336 }
  0x92   : > { %v467_v51 = vpop.permute.xlu1 %466  ;;  %v462_v53 = vpop.permute.xlu0 %461 }
  0x96   : > { %v457_v56 = vpop.permute.xlu1 %456  ;;  %v452_v61 = vpop.permute.xlu0 %451 }
  0xd4   : > { %v410_v14 = vpop.f32.mrf.mxu0 }
  0xd5   : > { %v411_v37 = vadd.f32 %v410_v14, %v332_v18 }
  0xd6   : > { %v412_v15 = vpop.f32.mrf.mxu0 }
  0xd7   : > { %v413_v30 = vadd.f32 %v412_v15, %v332_v18  ;;  %v429_v44 = vmax.f32 %v411_v37, 0.0  ;;  %v556_v18 = vpop.permute.xlu0 %555 }
  0xd8   : > { %v414_v16 = vpop.f32.mrf.mxu0 }
  0xd9   : > { %v415_v32 = vadd.f32 %v414_v16, %v337_v23  ;;  %v430_v39 = vmax.f32 %v413_v30, 0.0  ;;  %v551_v16 = vld [vmem:[%s911_s5] sm:$0x3] }
  0xda   : > { %v416_v19 = vpop.f32.mrf.mxu0 }
  0xdb   : > { %v417_v25 = vadd.f32 %v416_v19, %v337_v23  ;;  %v431_v41 = vmax.f32 %v415_v32, 0.0 }
  0xdc   : > { %v420_v20 = vpop.f32.mrf.mxu0 }
  0xdd   : > { %v421_v28 = vadd.f32 %v420_v20, %v342_v17  ;;  %v432_v34 = vmax.f32 %v417_v25, 0.0  ;;  %v437_v45 = vpack.c.bf16 %v431_v41, %v429_v44 }
  0xde   : > { %v422_v21 = vpop.f32.mrf.mxu0 }
  0xdf   : > { %v423_v26 = vadd.f32 %v422_v21, %v342_v17  ;;  %v433_v38 = vmax.f32 %v421_v28, 0.0  ;;  %v438_v43 = vpack.c.bf16 %v432_v34, %v430_v39 }
  0xe0   : > { %v424_v24 = vpop.f32.mrf.mxu0 }
  0xe1   : > { %v425_v27 = vadd.f32 %v424_v24, %v347_v22  ;;  %v434_v35 = vmax.f32 %v423_v26, 0.0 }
  0xe2   : > { %v426_v29 = vpop.f32.mrf.mxu0 }
  0xe3   : > { %v427_v31 = vadd.f32 %v426_v29, %v347_v22  ;;  %v435_v33 = vmax.f32 %v425_v27, 0.0 }
  0xe5   : > { %v436_v36 = vmax.f32 %v427_v31, 0.0  ;;  %v439_v42 = vpack.c.bf16 %v435_v33, %v433_v38 }
  0xe7   : > { %v440_v40 = vpack.c.bf16 %v436_v36, %v434_v35 }
  0xe9   : > { %498 = vmatprep.subr.bf16.mxu1 %v440_v40 }
  0xea   : > { %499 = vmatpush1.bf16.msra.mxu1 %v439_v42 }
  0xeb   : > { %500 = vmatprep.subr.bf16.mxu1 %v438_v43 }
  0xee   : > { %501 = vmatpush1.bf16.msra.mxu1 %v437_v45 }
  0xf1   : > { %711 = vmatmul.mubr.msk.bf16.vlgmr.msra.gmra.mxu1 %vm479_vm1, %v750_v46 }
  0xf2   : > { %528 = vmatprep.mubr.bf16.mxu1 %v776_v0 }
  0xf9   : > { %712 = vmatmul.mubr.msk.bf16.gmra.mxu1 %vm479_vm1, %v751_v47 }
 0x1b1   : > { %v520_v48 = vpop.f32.mrf.mxu1 }
 0x1b2   : > { %v521_v7 = vadd.f32 %v520_v48, %v452_v61 }
 0x1b3   : > { %v522_v49 = vpop.f32.mrf.mxu1 }
 0x1b4   : > { %v523_v0 = vadd.f32 %v522_v49, %v452_v61  ;;  %v539_v14 = vmax.f32 %v521_v7, 0.0 }
 0x1b5   : > { %v524_v50 = vpop.f32.mrf.mxu1 }
 0x1b6   : > { %v525_v2 = vadd.f32 %v524_v50, %v457_v56  ;;  %v540_v9 = vmax.f32 %v523_v0, 0.0 }
 0x1b7   : > { %v526_v52 = vpop.f32.mrf.mxu1 }
 0x1b8   : > { %v527_v58 = vadd.f32 %v526_v52, %v457_v56  ;;  %v541_v11 = vmax.f32 %v525_v2, 0.0 }
 0x1b9   : > { %v530_v54 = vpop.f32.mrf.mxu1 }
 0x1ba   : > { %v531_v62 = vadd.f32 %v530_v54, %v462_v53  ;;  %v542_v4 = vmax.f32 %v527_v58, 0.0  ;;  %v547_v15 = vpack.c.bf16 %v541_v11, %v539_v14 }
 0x1bb   : > { %v532_v55 = vpop.f32.mrf.mxu1 }
 0x1bc   : > { %v533_v59 = vadd.f32 %v532_v55, %v462_v53  ;;  %v543_v8 = vmax.f32 %v531_v62, 0.0  ;;  %v548_v13 = vpack.c.bf16 %v542_v4, %v540_v9 }
 0x1bd   : > { %v534_v57 = vpop.f32.mrf.mxu1 }
 0x1be   : > { %v535_v60 = vadd.f32 %v534_v57, %v467_v51  ;;  %v544_v5 = vmax.f32 %v533_v59, 0.0 }
 0x1bf   : > { %v536_v63 = vpop.f32.mrf.mxu1 }
 0x1c0   : > { %v537_v1 = vadd.f32 %v536_v63, %v467_v51  ;;  %v545_v3 = vmax.f32 %v535_v60, 0.0 }
 0x1c2   : > { %v546_v6 = vmax.f32 %v537_v1, 0.0  ;;  %v549_v12 = vpack.c.bf16 %v545_v3, %v543_v8 }
 0x1c4   : > { %v550_v10 = vpack.c.bf16 %v546_v6, %v544_v5 }
 0x1c6   : > { %573 = vmatprep.subr.bf16.mxu0 %v550_v10 }
 0x1c7   : > { %574 = vmatpush1.bf16.msra.mxu0 %v549_v12 }
 0x1c8   : > { %575 = vmatprep.subr.bf16.mxu0 %v548_v13 }
 0x1cb   : > { %576 = vmatpush1.bf16.msra.mxu0 %v547_v15 }
 0x1ce   : > { %713 = vmatmul.mubr.msk.bf16.vlgmr.msra.gmra.mxu0 %vm479_vm1, %v551_v16 }
 0x28e   : > { %v595_v17 = vpop.f32.mrf.mxu0 }
 0x28f   : > { %v596_v20 = vadd.f32 %v595_v17, %v556_v18 }
 0x290   : > { %v597_v19 = vpop.f32.mrf.mxu0 }
 0x291   : > { %v598_v21 = vadd.f32 %v597_v19, %v556_v18 }
 0x292   : > { %v599_v22 = vpop.f32.mrf.mxu0 }
 0x293   : > { %v604_v23 = vcombine.low %v596_v20, %v598_v21 }
 0x294   : > { %v600_v24 = vpop.f32.mrf.mxu0 }
 0x295   : > { %606 = vst [vmem:[%s316_s21] sm:$0xff] %v604_v23 }
 0x296 PF: > { %s17_s26 = sadd.s32 1, %s774_s26   ;;  %s914_s24 = smov %s770_s25 }
 0x297   : > { %p14_p5 = scmp.ge.s32.totalorder %s17_s26, 4   ;;  %s915_s25 = smov %s917_s27 }
 0x299   :  { %16 = sbr.rel (!%p14_p5) target bundleno = 2 (0x2), region = 78 }

</bundles_post_ra>
